<compile_context>
chip_gen: v7x
topology: tpu7x:2x2x1
jax: 0.10.0
libtpu: 0.0.40
codegen_flags: <defaults>
</compile_context>

<pallas_src>
import functools

import jax
import jax.numpy as jnp
from jax import lax
from jax.experimental import pallas as pl
from jax.experimental.pallas import tpu as pltpu


def _conv3x3_kernel(x_ref, w_ref, b_ref, o_ref, *, H, Wp):
    """3x3 / pad=1 conv for one batch element as a single lane-dense matmul.

    x_ref: (1, Cin, Lp)       flattened zero-padded image, row length Wp
    w_ref: (Cout, 9*Cin)      taps; contraction index k = (kh*3 + kw)*Cin + c
    b_ref: (Cout, 1)          bias column
    o_ref: (1, Cout, H*Wp)    width-extended output (lane-dense last dim)
    """
    n_ext = H * Wp
    # In-register im2col: each tap is a contiguous flat window of the padded
    # image (static ref slice -> no value reshape / transpose), stacked along
    # the contraction axis -> one K = 9*Cin MXU matmul.
    slabs = []
    for kh in range(3):
        for kw in range(3):
            base = kh * Wp + kw
            slabs.append(x_ref[0, :, base:base + n_ext])      # (Cin, H*Wp)
    cols = jnp.concatenate(slabs, axis=0)                      # (9*Cin, H*Wp)
    acc = jnp.dot(w_ref[...], cols, preferred_element_type=jnp.float32)
    # Bias: one sublane-broadcast add on the lane-dense accumulator.
    o_ref[0] = (acc + b_ref[...]).astype(o_ref.dtype)          # (Cout, H*Wp)


@jax.jit
def conv3x3_forward(x_nchw, weight_oihw, bias):
    """Pallas forward of New1_noBSN: y = Conv2d(x, k=3, pad=1) + bias (NCHW)."""
    N, Cin, H, W = x_nchw.shape
    Cout = weight_oihw.shape[0]
    Wp = W + 2                    # padded row length (1 left + 1 right)
    Hp = H + 3                    # 1 top + 1 bottom halo + 1 overrun row
    L = Hp * Wp
    n_ext = H * Wp                # width-extended output length per image

    # Pad once and flatten (H, W); the reshape of the contiguous NCHW array is
    # free, and it makes every (kh, kw) tap a contiguous lane slice in-kernel.
    xp = jnp.pad(x_nchw, ((0, 0), (0, 0), (1, 2), (1, 1)))
    x_flat = xp.reshape(N, Cin, L)

    # (Cout, Cin, 3, 3) -> (Cout, 9*Cin) with k = (kh*3 + kw)*Cin + c, matching
    # the slab stacking order inside the kernel.
    w_mat = jnp.transpose(weight_oihw, (0, 2, 3, 1)).reshape(Cout, 9 * Cin)
    b_col = bias.reshape(Cout, 1)

    out_flat = pl.pallas_call(
        functools.partial(_conv3x3_kernel, H=H, Wp=Wp),
        out_shape=jax.ShapeDtypeStruct((N, Cout, n_ext), jnp.float32),
        grid=(N,),
        in_specs=[
            pl.BlockSpec((1, Cin, L), lambda n: (n, 0, 0)),
            pl.BlockSpec((Cout, 9 * Cin), lambda n: (0, 0)),
            pl.BlockSpec((Cout, 1), lambda n: (0, 0)),
        ],
        out_specs=pl.BlockSpec((1, Cout, n_ext), lambda n: (n, 0, 0)),
        compiler_params=pltpu.CompilerParams(
            dimension_semantics=("parallel",)),
    )(x_flat, w_mat, b_col)

    # Drop the 2 garbage columns per row; pure reshape + slice, no transpose.
    return out_flat.reshape(N, Cout, H, Wp)[:, :, :, :W]


def _reference(x_nchw, weight_oihw, bias):
    """Pure-JAX reference (standard 3x3 conv, padding=1) for correctness."""
    out = lax.conv_general_dilated(
        x_nchw, weight_oihw,
        window_strides=(1, 1),
        padding=((1, 1), (1, 1)),
        dimension_numbers=("NCHW", "OIHW", "NCHW"))
    return out + bias[None, :, None, None]


if __name__ == "__main__":
    # Small shapes consistent with the module: batch=2, in_ch=4, out_ch=8,
    # spatial=16.
    N, Cin, Cout, H, W = 2, 4, 8, 16, 16

    key = jax.random.PRNGKey(0)
    kx, kw, kb = jax.random.split(key, 3)
    x = jax.random.normal(kx, (N, Cin, H, W), jnp.float32)
    # Deterministic parameter init (kaiming-uniform-like bound, fixed key).
    fan_in = Cin * 3 * 3
    bound = 1.0 / (fan_in ** 0.5)
    weight = jax.random.uniform(kw, (Cout, Cin, 3, 3), jnp.float32,
                                minval=-bound, maxval=bound)
    bias = jax.random.uniform(kb, (Cout,), jnp.float32,
                              minval=-bound, maxval=bound)

    out = jax.block_until_ready(conv3x3_forward(x, weight, bias))
    ref = jax.block_until_ready(_reference(x, weight, bias))

    assert out.shape == (N, Cout, H, W), out.shape
    assert jnp.allclose(out, ref, atol=1e-4, rtol=1e-4), \
        float(jnp.max(jnp.abs(out - ref)))

    print("KERNEL_OK")
</pallas_src>

<mosaic_0001>
module attributes {stable_mosaic.version = 11 : i64} {
  func.func @_conv3x3_kernel(%arg0: i32, %arg1: memref<1x4x342xf32, #tpu.memory_space<vmem>>, %arg2: memref<8x36xf32, #tpu.memory_space<vmem>>, %arg3: memref<8x1xf32, #tpu.memory_space<vmem>>, %arg4: memref<1x8x288xf32, #tpu.memory_space<vmem>>) attributes {dimension_semantics = [#tpu.dimension_semantics<parallel>], iteration_bounds = array<i64: 2>, scalar_prefetch = 0 : i64, scratch_operands = 0 : i64, tpu.core_type = #tpu.core_type<tc>, window_params = [{transform_indices = @transform_0, window_bounds = array<i64: 1, 4, 342>}, {pipeline_mode = #tpu.pipeline_mode<synchronous>, transform_indices = @transform_1, window_bounds = array<i64: 8, 36>}, {pipeline_mode = #tpu.pipeline_mode<synchronous>, transform_indices = @transform_2, window_bounds = array<i64: 8, 1>}, {transform_indices = @transform_3, window_bounds = array<i64: 1, 8, 288>}]} {
    %c0 = arith.constant 0 : index
    %c0_0 = arith.constant 0 : index
    %c0_1 = arith.constant 0 : index
    %0 = vector.load %arg1[%c0, %c0_0, %c0_1] : memref<1x4x342xf32, #tpu.memory_space<vmem>>, vector<1x4x288xf32>
    %1 = vector.shape_cast %0 : vector<1x4x288xf32> to vector<4x288xf32>
    %c0_2 = arith.constant 0 : index
    %c0_3 = arith.constant 0 : index
    %c1 = arith.constant 1 : index
    %2 = vector.load %arg1[%c0_2, %c0_3, %c1] : memref<1x4x342xf32, #tpu.memory_space<vmem>>, vector<1x4x288xf32>
    %3 = vector.shape_cast %2 : vector<1x4x288xf32> to vector<4x288xf32>
    %c0_4 = arith.constant 0 : index
    %c0_5 = arith.constant 0 : index
    %c2 = arith.constant 2 : index
    %4 = vector.load %arg1[%c0_4, %c0_5, %c2] : memref<1x4x342xf32, #tpu.memory_space<vmem>>, vector<1x4x288xf32>
    %5 = vector.shape_cast %4 : vector<1x4x288xf32> to vector<4x288xf32>
    %c0_6 = arith.constant 0 : index
    %c0_7 = arith.constant 0 : index
    %c18 = arith.constant 18 : index
    %6 = vector.load %arg1[%c0_6, %c0_7, %c18] : memref<1x4x342xf32, #tpu.memory_space<vmem>>, vector<1x4x288xf32>
    %7 = vector.shape_cast %6 : vector<1x4x288xf32> to vector<4x288xf32>
    %c0_8 = arith.constant 0 : index
    %c0_9 = arith.constant 0 : index
    %c19 = arith.constant 19 : index
    %8 = vector.load %arg1[%c0_8, %c0_9, %c19] : memref<1x4x342xf32, #tpu.memory_space<vmem>>, vector<1x4x288xf32>
    %9 = vector.shape_cast %8 : vector<1x4x288xf32> to vector<4x288xf32>
    %c0_10 = arith.constant 0 : index
    %c0_11 = arith.constant 0 : index
    %c20 = arith.constant 20 : index
    %10 = vector.load %arg1[%c0_10, %c0_11, %c20] : memref<1x4x342xf32, #tpu.memory_space<vmem>>, vector<1x4x288xf32>
    %11 = vector.shape_cast %10 : vector<1x4x288xf32> to vector<4x288xf32>
    %c0_12 = arith.constant 0 : index
    %c0_13 = arith.constant 0 : index
    %c36 = arith.constant 36 : index
    %12 = vector.load %arg1[%c0_12, %c0_13, %c36] : memref<1x4x342xf32, #tpu.memory_space<vmem>>, vector<1x4x288xf32>
    %13 = vector.shape_cast %12 : vector<1x4x288xf32> to vector<4x288xf32>
    %c0_14 = arith.constant 0 : index
    %c0_15 = arith.constant 0 : index
    %c37 = arith.constant 37 : index
    %14 = vector.load %arg1[%c0_14, %c0_15, %c37] : memref<1x4x342xf32, #tpu.memory_space<vmem>>, vector<1x4x288xf32>
    %15 = vector.shape_cast %14 : vector<1x4x288xf32> to vector<4x288xf32>
    %c0_16 = arith.constant 0 : index
    %c0_17 = arith.constant 0 : index
    %c38 = arith.constant 38 : index
    %16 = vector.load %arg1[%c0_16, %c0_17, %c38] : memref<1x4x342xf32, #tpu.memory_space<vmem>>, vector<1x4x288xf32>
    %17 = vector.shape_cast %16 : vector<1x4x288xf32> to vector<4x288xf32>
    %18 = tpu.concatenate %1, %3, %5, %7, %9, %11, %13, %15, %17 in 0 : vector<4x288xf32>, vector<4x288xf32>, vector<4x288xf32>, vector<4x288xf32>, vector<4x288xf32>, vector<4x288xf32>, vector<4x288xf32>, vector<4x288xf32>, vector<4x288xf32> -> vector<36x288xf32>
    %c0_18 = arith.constant 0 : index
    %c0_19 = arith.constant 0 : index
    %19 = vector.load %arg2[%c0_18, %c0_19] : memref<8x36xf32, #tpu.memory_space<vmem>>, vector<8x36xf32>
    %cst = arith.constant dense<0.000000e+00> : vector<8x288xf32>
    %20 = tpu.matmul %19, %18, %cst {dimension_numbers = #tpu.dot_dimension_numbers<[1], [0], [0], [1], [0, 0, 1, 1], [], []>} : vector<8x36xf32>, vector<36x288xf32>, vector<8x288xf32> -> vector<8x288xf32>
    %c0_20 = arith.constant 0 : index
    %c0_21 = arith.constant 0 : index
    %21 = vector.load %arg3[%c0_20, %c0_21] : memref<8x1xf32, #tpu.memory_space<vmem>>, vector<8x1xf32>
    %22 = vector.broadcast %21 : vector<8x1xf32> to vector<8x288xf32>
    %23 = arith.addf %20, %22 : vector<8x288xf32>
    %c0_22 = arith.constant 0 : index
    %c0_23 = arith.constant 0 : index
    %c0_24 = arith.constant 0 : index
    %24 = vector.load %arg4[%c0_22, %c0_23, %c0_24] : memref<1x8x288xf32, #tpu.memory_space<vmem>>, vector<1x8x288xf32>
    %25 = vector.shape_cast %24 : vector<1x8x288xf32> to vector<8x288xf32>
    %26 = vector.shape_cast %23 : vector<8x288xf32> to vector<1x8x288xf32>
    tpu.vector_store %arg4[%c0_22, %c0_23, %c0_24], %26 {strides = array<i32>} : memref<1x8x288xf32, #tpu.memory_space<vmem>>, vector<1x8x288xf32>,
    return
  }
  func.func @transform_0(%arg0: i32) -> (i32, i32, i32) {
    %c0_i32 = arith.constant 0 : i32
    %c0_i32_0 = arith.constant 0 : i32
    %c0_i32_1 = arith.constant 0 : i32
    return %arg0, %c0_i32, %c0_i32_0 : i32, i32, i32
  }
  func.func @transform_1(%arg0: i32) -> (i32, i32) {
    %c0_i32 = arith.constant 0 : i32
    %c0_i32_0 = arith.constant 0 : i32
    %c0_i32_1 = arith.constant 0 : i32
    return %c0_i32, %c0_i32_0 : i32, i32
  }
  func.func @transform_2(%arg0: i32) -> (i32, i32) {
    %c0_i32 = arith.constant 0 : i32
    %c0_i32_0 = arith.constant 0 : i32
    %c0_i32_1 = arith.constant 0 : i32
    return %c0_i32, %c0_i32_0 : i32, i32
  }
  func.func @transform_3(%arg0: i32) -> (i32, i32, i32) {
    %c0_i32 = arith.constant 0 : i32
    %c0_i32_0 = arith.constant 0 : i32
    %c0_i32_1 = arith.constant 0 : i32
    return %arg0, %c0_i32, %c0_i32_0 : i32, i32, i32
  }
}

</mosaic_0001>

<bundles_post_ra>
// kernel: conv3x3_forward.1
= control target key start
LH: loop header
LB: loop body
LE: loop exit
PB: predicated region body
PF: predicated region fallthrough
CT: control target
= control target key end

     0   :  { %s651_s12 = smov 0   ;;  %s718_s0 = inlined_call_operand.vmem [shape: f32[2,4,342], index: 0, kind: input, shape index: {}]   ;;  %s719_s1 = inlined_call_operand.vmem [shape: f32[8,36], index: 1, kind: input, shape index: {}]   ;;  %s720_s2 = inlined_call_operand.vmem [shape: f32[8,1], index: 2, kind: input, shape index: {}]   ;;  %s721_s3 = inlined_call_operand.vmem [shape: f32[2,8,288], index: 3, kind: output, shape index: {}]  }
   0x1 LB: > { %s502_s13 = sadd.s32 4294967295, %s617_s12   ;;  %p506_p0 = scmp.ge.s32.totalorder %s617_s12, 1  ;;  %s617_s12 = sphi %s651_s12, %s13_s12  }
   0x2   : > { %p137_p1 = scmp.lt.s32.totalorder %s617_s12, 3 }
   0x4   : > { %p138_p2 = pnand %p506_p0, %p137_p1 }
   0x5   : > { %p161_p3 = scmp.lt.s32.totalorder (!%p138_p2), %s502_s13, 1  ;;  %v619_v2 = vmov (!%p138_p2), 0.0|0.0   ;;  %s620_s18 = smov (!%p138_p2), 126   ;;  %v627_v8 = vmov (!%p138_p2), 0.0   ;;  %vm628_vm0 = vmmov (!%p138_p2), 0   ;;  %v629_v9 = vmov (!%p138_p2), 0  }
   0x6   : > { %141 = sbr.rel (%p138_p2) target bundleno = 386 (0x182), region = 32  ;;  %543 = vmatprep.subr.bf16.mxu1 (!%p138_p2), %v619_v2  ;;  %s621_s19 = smov (!%p138_p2), 110   ;;  %366 = vmatprep.mubr.f32.mxu0 (!%p138_p2), %v627_v8  ;;  %v286_v10 = vld [vmem:[%s720_s2] sm:$0xff] (!%p138_p2)  ;;  %vm185_vm1 = vcmask (!%p138_p2), 1039360   ;;  %vm272_vm2 = vcmask (!%p138_p2), 1043456   ;;  %vm209_vm3 = vcmask (!%p138_p2), 900096  }
   0x7   : > { %s622_s20 = smov (!%p138_p2), 127   ;;  %s623_s21 = smov (!%p138_p2), 109   ;;  %532 = vmatprep.mubr.msk.f32.mxu1 (!%p138_p2), %vm628_vm0, %v627_v8  ;;  %606 = vset.pattern.permute.xlu1 (!%p138_p2), %v629_v9  ;;  %vm197_vm4 = vcmask (!%p138_p2), 1031168   ;;  %vm221_vm5 = vcmask (!%p138_p2), 891904   ;;  %vm233_vm6 = vcmask (!%p138_p2), 883712   ;;  %vm245_vm7 = vcmask (!%p138_p2), 752640  }
   0x8   : > { %s624_s22 = smov (!%p138_p2), 108   ;;  %s625_s23 = smov (!%p138_p2), 92   ;;  %607 = vset.pattern.permute.xlu0 (!%p138_p2), %v629_v9  ;;  %vm257_vm8 = vcmask (!%p138_p2), 744448   ;;  %vm269_vm9 = vcmask (!%p138_p2), 736256   ;;  %v285_v9 = vld [vmem:[%s719_s1] sm:$0xff] (!%p138_p2)  ;;  %vm292_vm10 = vcmask (!%p138_p2), 293888  }
   0x9   : > { %s626_s24 = smov (!%p138_p2), 91   ;;  %s630_s25 = smov (!%p138_p2), 90   ;;  %vm445_vm11 = vcmask (!%p138_p2), 261120  }
   0xd   : > { %s723_s13 = smov (!%p161_p3, %s502_s13), 1 }
   0xe   : > { %s549_s14 = smul.u32 12, %s723_s13 }
   0xf   : > { %s550_s30 = smul.u32 24, %s723_s13 }
  0x10   : > { %s165_s17 = scalar_lea.vmem %s718_s0, %s549_s14 }
  0x11   : > { %v665_v0 = vld [vmem:[%s165_s17] sm:$0xff]  ;;  %v172_v1 = vld [vmem:[%s165_s17 + $0x8] sm:$0xf]  ;;  %s170_s6 = scalar_lea.vmem %s721_s3, %s550_s30 }
  0x12   : > { %191 = vrot.lane.b32.xlu0 %v665_v0, %s620_s18  ;;  %v178_v3 = vcombine.low %v172_v1, %v172_v1  ;;  %v175_v4 = vcombine.high %v665_v0, %v665_v0  ;;  %v177_v6 = vcombine.low %v665_v0, %v665_v0 }
  0x14   : > { %v581_v5 = vpack.i.bf16 %v178_v3, %v665_v0  ;;  %v576_v7 = vpack.i.bf16 %v172_v1, %v175_v4 }
  0x16   : > { %582 = vrot.lane.b32.xlu1 %v581_v5, %s621_s19  ;;  %572 = vrot.lane.b32.xlu0 %v581_v5, %s622_s20 }
  0x1a   : > { %179 = vrot.lane.b32.xlu1 %v177_v6, %s622_s20  ;;  %577 = vrot.lane.b32.xlu0 %v576_v7, %s620_s18 }
  0x1e   : > { %203 = vrot.lane.b32.xlu1 %v177_v6, %s621_s19  ;;  %587 = vrot.lane.b32.xlu0 %v576_v7, %s623_s21 }
  0x22   : > { %592 = vrot.lane.b32.xlu1 %v581_v5, %s624_s22  ;;  %597 = vrot.lane.b32.xlu0 %v576_v7, %s625_s23 }
  0x26   : > { %602 = vrot.lane.b32.xlu1 %v581_v5, %s626_s24  ;;  %215 = vrot.lane.b32.xlu0 %v665_v0, %s623_s21 }
  0x2a   : > { %227 = vrot.lane.b32.xlu1 %v177_v6, %s624_s22  ;;  %239 = vrot.lane.b32.xlu0 %v665_v0, %s625_s23 }
  0x2e   : > { %251 = vrot.lane.b32.xlu1 %v177_v6, %s626_s24  ;;  %265 = vrot.lane.b32.xlu0 %v175_v4, %s630_s25 }
  0x32   : > { %267 = vrot.lane.b32.xlu1 %v172_v1, %s630_s25  ;;  %263 = vrot.lane.b32.xlu0 %v665_v0, %s630_s25 }
  0x36   : > { %289 = vperm.xlu1 %606, %v286_v10  }
  0x84   : > { %v192_v11 = vpop.permute.xlu0 %191 }
  0x88   : > { %v583_v12 = vpop.permute.xlu1 %582  ;;  %v573_v13 = vpop.permute.xlu0 %572 }
  0x89   : > { %v575_v14 = vunpack.i.h.bf16 %v573_v13  ;;  %v574_v15 = vunpack.i.l.bf16 %v573_v13  ;;  %v585_v16 = vunpack.i.h.bf16 %v583_v12  ;;  %v584_v17 = vunpack.i.l.bf16 %v583_v12 }
  0x8b   : > { %v187_v18 = vsel %vm185_vm1, %v574_v15, %v575_v14  ;;  %v275_v23 = vsel %vm272_vm2, %v172_v1, %v575_v14  ;;  %v211_v28 = vsel %vm209_vm3, %v584_v17, %v585_v16 }
  0x8c   : > { %v180_v19 = vpop.permute.xlu1 %179  ;;  %v578_v20 = vpop.permute.xlu0 %577  ;;  %v274_v24 = vsel %vm272_vm2, %v175_v4, %v187_v18 }
  0x8d   : > { %v580_v21 = vunpack.i.h.bf16 %v578_v20  ;;  %v579_v22 = vunpack.i.l.bf16 %v578_v20  ;;  %v186_v25 = vsel %vm185_vm1, %v180_v19, %v574_v15 }
  0x8e   : > { %v273_v36 = vsel %vm272_vm2, %v665_v0, %v186_v25 }
  0x8f   : > { %v278_v26 = vsel %vm272_vm2, %v580_v21, %v585_v16  ;;  %v199_v27 = vsel %vm197_vm4, %v579_v22, %v580_v21  ;;  %v198_v35 = vsel %vm197_vm4, %v192_v11, %v579_v22 }
  0x90   : > { %v204_v29 = vpop.permute.xlu1 %203  ;;  %v588_v30 = vpop.permute.xlu0 %587  ;;  %v544_v31 = vpack.c.bf16 %v278_v26, %v275_v23  ;;  %v277_v32 = vsel %vm272_vm2, %v199_v27, %v211_v28 }
  0x91   : > { %v210_v33 = vsel %vm209_vm3, %v204_v29, %v584_v17  ;;  %v535_v34 = vpack.c.bf16 %v277_v32, %v274_v24  ;;  %v590_v39 = vunpack.i.h.bf16 %v588_v30  ;;  %v589_v40 = vunpack.i.l.bf16 %v588_v30 }
  0x92   : > { %545 = vmatpush3.bf16.msra.mxu1 %v544_v31  ;;  %v276_v37 = vsel %vm272_vm2, %v198_v35, %v210_v33 }
  0x93   : > { %536 = vmatprep.subr.bf16.mxu0 %v535_v34  ;;  %v537_v38 = vpack.c.bf16 %v276_v37, %v273_v36  ;;  %546 = vmatprep.subr.bf16.mxu1 %v619_v2  ;;  %v223_v49 = vsel %vm221_vm5, %v589_v40, %v590_v39 }
  0x94   : > { %v593_v41 = vpop.permute.xlu1 %592  ;;  %v598_v42 = vpop.permute.xlu0 %597 }
  0x95   : > { %v595_v43 = vunpack.i.h.bf16 %v593_v41  ;;  %v594_v44 = vunpack.i.l.bf16 %v593_v41  ;;  %v600_v45 = vunpack.i.h.bf16 %v598_v42  ;;  %v599_v46 = vunpack.i.l.bf16 %v598_v42  ;;  %538 = vmatpush1.bf16.msra.mxu0 %v537_v38 }
  0x97   : > { %v235_v52 = vsel %vm233_vm6, %v594_v44, %v595_v43  ;;  %v247_v53 = vsel %vm245_vm7, %v599_v46, %v600_v45  ;;  %v281_v55 = vsel %vm272_vm2, %v590_v39, %v595_v43 }
  0x98   : > { %v603_v47 = vpop.permute.xlu1 %602  ;;  %v216_v48 = vpop.permute.xlu0 %215  ;;  %v280_v60 = vsel %vm272_vm2, %v223_v49, %v235_v52 }
  0x99   : > { %v605_v50 = vunpack.i.h.bf16 %v603_v47  ;;  %v604_v51 = vunpack.i.l.bf16 %v603_v47  ;;  %v222_v2 = vsel %vm221_vm5, %v216_v48, %v589_v40 }
  0x9b   : > { %v259_v54 = vsel %vm257_vm8, %v604_v51, %v605_v50  ;;  %v284_v56 = vsel %vm272_vm2, %v600_v45, %v605_v50 }
  0x9c   : > { %v228_v57 = vpop.permute.xlu1 %227  ;;  %v240_v58 = vpop.permute.xlu0 %239  ;;  %v547_v59 = vpack.c.bf16 %v284_v56, %v281_v55  ;;  %v283_v61 = vsel %vm272_vm2, %v247_v53, %v259_v54 }
  0x9d   : > { %v539_v62 = vpack.c.bf16 %v283_v61, %v280_v60  ;;  %v234_v63 = vsel %vm233_vm6, %v228_v57, %v594_v44  ;;  %v246_v3 = vsel %vm245_vm7, %v240_v58, %v599_v46 }
  0x9e   : > { %548 = vmatpush3.bf16.msra.mxu1 %v547_v59  ;;  %v279_v5 = vsel %vm272_vm2, %v222_v2, %v234_v63 }
  0x9f   : > { %540 = vmatprep.subr.bf16.mxu0 %v539_v62  ;;  %530 = vmatprep.subr.mxu1 %v627_v8 }
  0xa0   : > { %v252_v0 = vpop.permute.xlu1 %251  ;;  %v266_v1 = vpop.permute.xlu0 %265 }
  0xa1   : > { %v258_v4 = vsel %vm257_vm8, %v252_v0, %v604_v51 }
  0xa2   : > { %v282_v6 = vsel %vm272_vm2, %v246_v3, %v258_v4 }
  0xa3   : > { %v541_v7 = vpack.c.bf16 %v282_v6, %v279_v5 }
  0xa4   : > { %v268_v8 = vpop.permute.xlu1 %267  ;;  %v264_v11 = vpop.permute.xlu0 %263 }
  0xa5   : > { %v271_v10 = vsel %vm269_vm9, %v266_v1, %v268_v8  ;;  %542 = vmatpush1.bf16.msra.mxu0 %v541_v7  ;;  %531 = vmatpush3.msk.msra.mxu1 %vm272_vm2, %v268_v8  ;;  %v270_v12 = vsel %vm269_vm9, %v264_v11, %v266_v1 }
  0xa6   : > { %509 = vmatprep.subr.msk.mxu0 %vm272_vm2, %v271_v10  ;;  %533 = vmatmul.mubr.msk.f32.vlgmr.msra.gmra.mrb[0].mxu1 %vm292_vm10, %v285_v9 }
  0xa9   : > { %510 = vmatpush1.msk.msra.mxu0 %vm272_vm2, %v270_v12 }
  0xaa   : > { %511 = vmatmul.mubr.msk.f32.vlgmr.msra.gmra.mrb[0].mxu0 %vm292_vm10, %v285_v9 }
  0xb5   : > { %v290_v13 = vpop.permute.xlu1 %289 }
 0x179   : > { %v439_v14 = vpop.f32.mrb[0].mxu1 }
 0x17a   : > { %v440_v15 = vadd.f32 %v439_v14, %v290_v13  ;;  %v534_v16 = vpop.f32.mrb[1].mxu1 }
 0x17c   : > { %446 = vst.msk [vmem:[%s170_s6 + $0x10] sm:$0xff] %vm445_vm11, %v440_v15 }
 0x17d   : > { %v368_v17 = vpop.f32.mrb[0].mxu0 }
 0x17e   : > { %v369_v18 = vadd.f32 %v368_v17, %v290_v13  ;;  %v370_v19 = vpop.f32.mrb[1].mxu0 }
 0x17f   : > { %v371_v20 = vadd.f32 %v370_v19, %v290_v13 }
 0x180   : > { %443 = vst [vmem:[%s170_s6] sm:$0xff] %v369_v18 }
 0x181   : > { %444 = vst [vmem:[%s170_s6 + $0x8] sm:$0xff] %v371_v20 }
 0x182 PF: > { %s13_s12 = sadd.s32 1, %s617_s12  }
 0x183   : > { %p10_p4 = scmp.ge.s32.totalorder %s13_s12, 4  }
 0x185   :  { %12 = sbr.rel (!%p10_p4) target bundleno = 1 (0x1), region = 62 }

</bundles_post_ra>
